<compile_context>
chip_gen: v6e
topology: v6e:2x2x1
jax: 0.10.0
libtpu: 0.0.40
codegen_flags: <defaults>
</compile_context>

<pallas_src>
import functools

import jax
import jax.numpy as jnp
from jax.experimental import pallas as pl
from jax.experimental.pallas import tpu as pltpu

_MAX_TILE_B = 4096       # multiple of 1024; f32 x-tile at F=64 is 1 MiB (2 MiB double-buffered)
_MIN_PALLAS_BATCH = 256  # below this the Pallas call is pure launch/DMA overhead -> plain XLA


def _round_up(x, m):
    return -(-x // m) * m


def _make_mlp_kernel(num_hidden):
    """Kernel body: `num_hidden` (Linear -> ReLU) layers + final Linear(hidden -> 1)."""

    def kernel(*refs):
        x_ref = refs[0]
        o_ref = refs[-1]
        wb = refs[1:-1]

        # x arrives in its original f32 dtype (no wrapper-side cast/pad HBM round trip);
        # cast to bf16 only when feeding the MXU.
        h = x_ref[...]                                            # (tile_b, F) f32
        for li in range(num_hidden):
            w_ref = wb[2 * li]                                    # (in, out) bf16, VMEM-resident
            b_ref = wb[2 * li + 1]                                # (1, out)  f32
            h = jnp.dot(h.astype(jnp.bfloat16), w_ref[...],
                        preferred_element_type=jnp.float32)
            h = jnp.maximum(h + b_ref[...], 0.0)                  # ReLU, stays f32

        # Final Linear(h_last -> 1): VPU broadcast-multiply + lane reduce (an MXU matmul
        # with N=1 would push a nearly empty tile through the array and produce a
        # 1-lane-wide result), then reshape to the lane-dense output block so the store
        # is a full-width vst instead of masked partial stores.
        w_row_ref = wb[2 * num_hidden]                            # (1, h_last) f32
        b_last_ref = wb[2 * num_hidden + 1]                       # (1, 1)      f32
        v = jnp.sum(h * w_row_ref[...], axis=-1, keepdims=True)   # (tile_b, 1) f32
        out_rows, out_lanes = o_ref.shape                         # (tile_b//128, 128)
        v = v.reshape(out_rows, out_lanes) + b_last_ref[...]
        o_ref[...] = v.astype(o_ref.dtype)

    return kernel


def prepare_params(params):
    """One-time prep of PyTorch-shaped Linear params.

    Hidden layers: weight (out,in) -> (in,out) bf16 (MXU operand), bias -> (1,out) f32.
    Final layer (out=1): weight kept as an f32 row (1,in) for the VPU reduce, bias (1,1) f32.
    """
    prepared = []
    n = len(params)
    for i, (w, b) in enumerate(params):
        w = jnp.asarray(w, jnp.float32)
        b = jnp.asarray(b, jnp.float32).reshape(1, -1)
        if i < n - 1:
            prepared.append((w.T.astype(jnp.bfloat16), b))
        else:
            prepared.append((w.reshape(1, -1), b.reshape(1, 1)))
    return tuple(prepared)


def _choose_tile_b(batch_dim):
    """Batch tile size: multiple of 128 (lane-dense output).  Multi-tile grids use
    multiples of 1024 so the output block's sublane dim stays 8-aligned, and aim for
    >= 2 (even) tiles so both v7x TensorCores get balanced work; capped at _MAX_TILE_B."""
    if batch_dim <= 1024:
        return _round_up(batch_dim, 128)            # single tile
    n_tiles = max(2, -(-batch_dim // _MAX_TILE_B))
    if n_tiles % 2:
        n_tiles += 1                                # even tile count for the 2-TC v7x
    return _round_up(-(-batch_dim // n_tiles), 1024)


def _xla_forward(x2d, prepared_params):
    """Fallback for tiny batches (same bf16-matmul / f32-accumulate semantics)."""
    h = x2d
    for wt, b in prepared_params[:-1]:
        h = jnp.dot(h.astype(jnp.bfloat16), wt, preferred_element_type=jnp.float32)
        h = jnp.maximum(h + b, 0.0)
    w_last, b_last = prepared_params[-1]
    return (jnp.sum(h * w_last, axis=-1, keepdims=True) + b_last).astype(jnp.float32)


@functools.partial(jax.jit, static_argnames=("min_pallas_batch",))
def value_baseline_forward(state_batch, prepared_params, *,
                           min_pallas_batch=_MIN_PALLAS_BATCH):
    """prepared_params = prepare_params(((w1,b1),(w2,b2),...)) with PyTorch Linear shapes."""
    batch_dim = state_batch.shape[0]
    x2d = state_batch.reshape(batch_dim, -1).astype(jnp.float32)

    if batch_dim < min_pallas_batch:
        # At tiny batches the Pallas call is pure launch/DMA overhead; let XLA fuse it.
        return _xla_forward(x2d, prepared_params)

    feat_dim = x2d.shape[1]
    num_hidden = len(prepared_params) - 1

    tile_b = _choose_tile_b(batch_dim)
    grid_len = -(-batch_dim // tile_b)
    padded_b = grid_len * tile_b                     # edge block masked by Pallas, no jnp.pad

    # x streams by batch tile; weights/biases use constant block indices -> DMA'd once.
    in_specs = [pl.BlockSpec((tile_b, feat_dim), lambda i: (i, 0))]
    flat_wb = []
    for w, b in prepared_params:
        in_specs.append(pl.BlockSpec(w.shape, lambda i: (0, 0)))
        in_specs.append(pl.BlockSpec(b.shape, lambda i: (0, 0)))
        flat_wb.extend((w, b))
    out_spec = pl.BlockSpec((tile_b // 128, 128), lambda i: (i, 0))

    # Advisory cost estimate so XLA schedules the producer/consumer ops around the call.
    flops = 2 * padded_b * sum(
        int(w.shape[0]) * int(w.shape[1]) if i < num_hidden else int(w.shape[1])
        for i, (w, _) in enumerate(prepared_params))
    param_bytes = sum(int(w.size) * w.dtype.itemsize + int(b.size) * b.dtype.itemsize
                      for w, b in prepared_params)
    bytes_accessed = padded_b * feat_dim * 4 + param_bytes + padded_b * 4

    out = pl.pallas_call(
        _make_mlp_kernel(num_hidden),
        out_shape=jax.ShapeDtypeStruct((padded_b // 128, 128), jnp.float32),
        grid=(grid_len,),
        in_specs=in_specs,
        out_specs=out_spec,
        compiler_params=pltpu.CompilerParams(
            dimension_semantics=("parallel",),       # shard batch tiles across TCs on v7x
        ),
        cost_estimate=pl.CostEstimate(flops=flops, transcendentals=0,
                                      bytes_accessed=bytes_accessed),
    )(x2d, *flat_wb)

    return out.reshape(padded_b, 1)[:batch_dim]


def init_value_baseline_params(key, obs_dim, hidden_dims):
    """Deterministic init mimicking PyTorch Linear defaults:
    U(-1/sqrt(fan_in), 1/sqrt(fan_in)) for both weight and bias."""
    dims = [obs_dim] + list(hidden_dims) + [1]
    params = []
    for i in range(len(dims) - 1):
        fan_in, fan_out = dims[i], dims[i + 1]
        key, kw, kb = jax.random.split(key, 3)
        bound = 1.0 / jnp.sqrt(jnp.float32(fan_in))
        w = jax.random.uniform(kw, (fan_out, fan_in), jnp.float32, -bound, bound)
        b = jax.random.uniform(kb, (fan_out,), jnp.float32, -bound, bound)
        params.append((w, b))
    return tuple(params)


def _reference_forward(state_batch, params):
    """Pure f32 reference matching the PyTorch module."""
    x = state_batch.reshape(state_batch.shape[0], -1).astype(jnp.float32)
    h = x
    n = len(params)
    for li, (w, b) in enumerate(params):
        h = h @ w.T + b
        if li < n - 1:
            h = jnp.maximum(h, 0.0)
    return h


if __name__ == "__main__":
    key = jax.random.PRNGKey(0)
    key, k_x = jax.random.split(key)

    # Small shapes consistent with the module: observation (C,H,W)=(4,4,4),
    # flattened obs_dim = 64, hidden_dims = [32, 32], batch = 2.
    B, C, H, W = 2, 4, 4, 4
    obs_dim = C * H * W
    hidden_dims = [32, 32]

    state_batch = jax.random.normal(k_x, (B, C, H, W), jnp.float32)
    params = init_value_baseline_params(key, obs_dim, hidden_dims)
    prepared = prepare_params(params)
    ref = _reference_forward(state_batch, params)

    # Tiny batch, forced down the Pallas path (single 128-row tile, lane-dense output).
    out = jax.block_until_ready(value_baseline_forward(state_batch, prepared,
                                                       min_pallas_batch=0))
    assert out.shape == (B, 1)
    assert jnp.allclose(out, ref, atol=5e-2, rtol=5e-2), "small-batch (pallas) mismatch"

    # Same tiny batch via the default XLA fallback (batch < min_pallas_batch).
    out_fb = jax.block_until_ready(value_baseline_forward(state_batch, prepared))
    assert jnp.allclose(out_fb, ref, atol=5e-2, rtol=5e-2), "small-batch (fallback) mismatch"

    # Multi-tile batch exercising the pipelined grid (2 tiles of 1024: pipelined on a
    # single TC, one tile per TensorCore on v7x).
    B2 = 2048
    key, k_x2 = jax.random.split(key)
    state_batch2 = jax.random.normal(k_x2, (B2, C, H, W), jnp.float32)
    out2 = jax.block_until_ready(value_baseline_forward(state_batch2, prepared))
    ref2 = _reference_forward(state_batch2, params)
    assert out2.shape == (B2, 1)
    assert jnp.allclose(out2, ref2, atol=5e-2, rtol=5e-2), "tiled-batch mismatch"

    print("KERNEL_OK")
</pallas_src>

<mosaic_0001>
module attributes {stable_mosaic.version = 11 : i64} {
  func.func @kernel(%arg0: i32, %arg1: memref<128x64xf32, #tpu.memory_space<vmem>>, %arg2: memref<64x32xbf16, #tpu.memory_space<vmem>>, %arg3: memref<1x32xf32, #tpu.memory_space<vmem>>, %arg4: memref<32x32xbf16, #tpu.memory_space<vmem>>, %arg5: memref<1x32xf32, #tpu.memory_space<vmem>>, %arg6: memref<1x32xf32, #tpu.memory_space<vmem>>, %arg7: memref<1x1xf32, #tpu.memory_space<vmem>>, %arg8: memref<1x128xf32, #tpu.memory_space<vmem>>) attributes {dimension_semantics = [#tpu.dimension_semantics<parallel>], iteration_bounds = array<i64: 1>, scalar_prefetch = 0 : i64, scratch_operands = 0 : i64, tpu.core_type = #tpu.core_type<tc>, window_params = [{transform_indices = @transform_0, window_bounds = array<i64: 128, 64>}, {pipeline_mode = #tpu.pipeline_mode<synchronous>, transform_indices = @transform_1, window_bounds = array<i64: 64, 32>}, {pipeline_mode = #tpu.pipeline_mode<synchronous>, transform_indices = @transform_2, window_bounds = array<i64: 1, 32>}, {pipeline_mode = #tpu.pipeline_mode<synchronous>, transform_indices = @transform_3, window_bounds = array<i64: 32, 32>}, {pipeline_mode = #tpu.pipeline_mode<synchronous>, transform_indices = @transform_4, window_bounds = array<i64: 1, 32>}, {pipeline_mode = #tpu.pipeline_mode<synchronous>, transform_indices = @transform_5, window_bounds = array<i64: 1, 32>}, {pipeline_mode = #tpu.pipeline_mode<synchronous>, transform_indices = @transform_6, window_bounds = array<i64: 1, 1>}, {transform_indices = @transform_7, window_bounds = array<i64: 1, 128>}]} {
    %c0 = arith.constant 0 : index
    %c0_0 = arith.constant 0 : index
    %0 = vector.load %arg1[%c0, %c0_0] : memref<128x64xf32, #tpu.memory_space<vmem>>, vector<128x64xf32>
    %1 = arith.truncf %0 : vector<128x64xf32> to vector<128x64xbf16>
    %c0_1 = arith.constant 0 : index
    %c0_2 = arith.constant 0 : index
    %2 = vector.load %arg2[%c0_1, %c0_2] : memref<64x32xbf16, #tpu.memory_space<vmem>>, vector<64x32xbf16>
    %cst = arith.constant dense<0.000000e+00> : vector<128x32xf32>
    %3 = tpu.matmul %1, %2, %cst {dimension_numbers = #tpu.dot_dimension_numbers<[1], [0], [0], [1], [0, 0, 1, 1], [], []>} : vector<128x64xbf16>, vector<64x32xbf16>, vector<128x32xf32> -> vector<128x32xf32>
    %c0_3 = arith.constant 0 : index
    %c0_4 = arith.constant 0 : index
    %4 = vector.load %arg3[%c0_3, %c0_4] : memref<1x32xf32, #tpu.memory_space<vmem>>, vector<1x32xf32>
    %5 = vector.broadcast %4 : vector<1x32xf32> to vector<128x32xf32>
    %6 = arith.addf %3, %5 : vector<128x32xf32>
    %cst_5 = arith.constant 0.000000e+00 : f32
    %7 = vector.broadcast %cst_5 : f32 to vector<128x32xf32>
    %8 = arith.maximumf %6, %7 : vector<128x32xf32>
    %9 = arith.truncf %8 : vector<128x32xf32> to vector<128x32xbf16>
    %c0_6 = arith.constant 0 : index
    %c0_7 = arith.constant 0 : index
    %10 = vector.load %arg4[%c0_6, %c0_7] : memref<32x32xbf16, #tpu.memory_space<vmem>>, vector<32x32xbf16>
    %cst_8 = arith.constant dense<0.000000e+00> : vector<128x32xf32>
    %11 = tpu.matmul %9, %10, %cst_8 {dimension_numbers = #tpu.dot_dimension_numbers<[1], [0], [0], [1], [0, 0, 1, 1], [], []>} : vector<128x32xbf16>, vector<32x32xbf16>, vector<128x32xf32> -> vector<128x32xf32>
    %c0_9 = arith.constant 0 : index
    %c0_10 = arith.constant 0 : index
    %12 = vector.load %arg5[%c0_9, %c0_10] : memref<1x32xf32, #tpu.memory_space<vmem>>, vector<1x32xf32>
    %13 = vector.broadcast %12 : vector<1x32xf32> to vector<128x32xf32>
    %14 = arith.addf %11, %13 : vector<128x32xf32>
    %cst_11 = arith.constant 0.000000e+00 : f32
    %15 = vector.broadcast %cst_11 : f32 to vector<128x32xf32>
    %16 = arith.maximumf %14, %15 : vector<128x32xf32>
    %c0_12 = arith.constant 0 : index
    %c0_13 = arith.constant 0 : index
    %17 = vector.load %arg6[%c0_12, %c0_13] : memref<1x32xf32, #tpu.memory_space<vmem>>, vector<1x32xf32>
    %18 = vector.broadcast %17 : vector<1x32xf32> to vector<128x32xf32>
    %19 = arith.mulf %16, %18 : vector<128x32xf32>
    %cst_14 = arith.constant dense<0.000000e+00> : vector<128xf32>
    %20 = vector.multi_reduction <add>, %19, %cst_14 [1] : vector<128x32xf32> to vector<128xf32>
    %21 = vector.shape_cast %20 : vector<128xf32> to vector<128x1xf32>
    %22 = vector.shape_cast %21 : vector<128x1xf32> to vector<1x128xf32>
    %c0_15 = arith.constant 0 : index
    %c0_16 = arith.constant 0 : index
    %23 = vector.load %arg7[%c0_15, %c0_16] : memref<1x1xf32, #tpu.memory_space<vmem>>, vector<1x1xf32>
    %24 = vector.broadcast %23 : vector<1x1xf32> to vector<1x128xf32>
    %25 = arith.addf %22, %24 : vector<1x128xf32>
    %c0_17 = arith.constant 0 : index
    %c0_18 = arith.constant 0 : index
    %26 = vector.load %arg8[%c0_17, %c0_18] : memref<1x128xf32, #tpu.memory_space<vmem>>, vector<1x128xf32>
    tpu.vector_store %arg8[%c0_17, %c0_18], %25 {strides = array<i32>} : memref<1x128xf32, #tpu.memory_space<vmem>>, vector<1x128xf32>,
    return
  }
  func.func @transform_0(%arg0: i32) -> (i32, i32) {
    %c0_i32 = arith.constant 0 : i32
    %c0_i32_0 = arith.constant 0 : i32
    return %arg0, %c0_i32 : i32, i32
  }
  func.func @transform_1(%arg0: i32) -> (i32, i32) {
    %c0_i32 = arith.constant 0 : i32
    %c0_i32_0 = arith.constant 0 : i32
    %c0_i32_1 = arith.constant 0 : i32
    return %c0_i32, %c0_i32_0 : i32, i32
  }
  func.func @transform_2(%arg0: i32) -> (i32, i32) {
    %c0_i32 = arith.constant 0 : i32
    %c0_i32_0 = arith.constant 0 : i32
    %c0_i32_1 = arith.constant 0 : i32
    return %c0_i32, %c0_i32_0 : i32, i32
  }
  func.func @transform_3(%arg0: i32) -> (i32, i32) {
    %c0_i32 = arith.constant 0 : i32
    %c0_i32_0 = arith.constant 0 : i32
    %c0_i32_1 = arith.constant 0 : i32
    return %c0_i32, %c0_i32_0 : i32, i32
  }
  func.func @transform_4(%arg0: i32) -> (i32, i32) {
    %c0_i32 = arith.constant 0 : i32
    %c0_i32_0 = arith.constant 0 : i32
    %c0_i32_1 = arith.constant 0 : i32
    return %c0_i32, %c0_i32_0 : i32, i32
  }
  func.func @transform_5(%arg0: i32) -> (i32, i32) {
    %c0_i32 = arith.constant 0 : i32
    %c0_i32_0 = arith.constant 0 : i32
    %c0_i32_1 = arith.constant 0 : i32
    return %c0_i32, %c0_i32_0 : i32, i32
  }
  func.func @transform_6(%arg0: i32) -> (i32, i32) {
    %c0_i32 = arith.constant 0 : i32
    %c0_i32_0 = arith.constant 0 : i32
    %c0_i32_1 = arith.constant 0 : i32
    return %c0_i32, %c0_i32_0 : i32, i32
  }
  func.func @transform_7(%arg0: i32) -> (i32, i32) {
    %c0_i32 = arith.constant 0 : i32
    %c0_i32_0 = arith.constant 0 : i32
    return %arg0, %c0_i32 : i32, i32
  }
}

</mosaic_0001>

<bundles_post_ra>
// kernel: value_baseline_forward.1
= control target key start
LH: loop header
LB: loop body
LE: loop exit
PB: predicated region body
PF: predicated region fallthrough
CT: control target
= control target key end

     0   :  { %vm92_vm0 = vcmask 523264   ;;  %vm261_vm1 = vcmask 261120   ;;  %vm523_vm2 = vcmask 130112   ;;  %vm530_vm3 = vcmask 195712   ;;  %s978_s1 = inlined_call_operand.vmem [shape: bf16[64,32], index: 1, kind: input, shape index: {}]   ;;  %s979_s0 = inlined_call_operand.vmem [shape: f32[2,64], index: 0, kind: input, shape index: {}]   ;;  %s980_s3 = inlined_call_operand.vmem [shape: bf16[32,32], index: 3, kind: input, shape index: {}]   ;;  %s981_s2 = inlined_call_operand.vmem [shape: f32[1,32], index: 2, kind: input, shape index: {}]   ;;  %s982_s6 = inlined_call_operand.<no memory space> [shape: f32[1,1], index: 6, kind: input, shape index: {}]   ;;  %s983_s4 = inlined_call_operand.vmem [shape: f32[1,32], index: 4, kind: input, shape index: {}]   ;;  %s984_s5 = inlined_call_operand.vmem [shape: f32[1,32], index: 5, kind: input, shape index: {}]   ;;  %s985_s7 = inlined_call_operand.vmem [shape: f32[1,128], index: 7, kind: output, shape index: {}]  }
   0x1   :  { %v723_v0 = vld [vmem:[%s978_s1 + $0x18] sm:$0xff]   ;;  %v724_v1 = vld [vmem:[%s978_s1 + $0x10] sm:$0xff]   ;;  %v725_v2 = vld [vmem:[%s978_s1 + $0x8] sm:$0xff]   ;;  %vm537_vm4 = vcmask 261312   ;;  %vm544_vm5 = vcmask 326912   ;;  %vm551_vm6 = vcmask 392512  }
   0x2   :  { %676 = vmatprep.subr.bf16.mxu0 %v723_v0  ;;  %v29_v3 = vld [vmem:[%s979_s0] sm:$0xff]  ;;  %v30_v4 = vld [vmem:[%s979_s0 + $0x8] sm:$0xff]  ;;  %v31_v7 = vld [vmem:[%s979_s0 + $0x10] sm:$0xff]  ;;  %vm558_vm7 = vcmask 458112   ;;  %vm565_vm8 = vcmask 523712   ;;  %vm572_vm9 = vcmask 589312  }
   0x3   :  { %677 = vmatpush3.bf16.msra.mxu0 %v723_v0  ;;  %v45_v5 = vpack.c.bf16 %v30_v4, %v29_v3  ;;  %v726_v6 = vld [vmem:[%s978_s1] sm:$0xff]   ;;  %v32_v8 = vld [vmem:[%s979_s0 + $0x18] sm:$0xff]  ;;  %v34_v10 = vld [vmem:[%s979_s0 + $0x28] sm:$0xff]  ;;  %vm579_vm10 = vcmask 654912   ;;  %vm586_vm11 = vcmask 720512   ;;  %vm593_vm12 = vcmask 786112  }
   0x4   :  { %678 = vmatprep.subr.bf16.mxu0 %v724_v1  ;;  %v33_v9 = vld [vmem:[%s979_s0 + $0x20] sm:$0xff]  ;;  %v46_v11 = vpack.c.bf16 %v32_v8, %v31_v7  ;;  %v35_v13 = vld [vmem:[%s979_s0 + $0x30] sm:$0xff]  ;;  %v36_v14 = vld [vmem:[%s979_s0 + $0x38] sm:$0xff]  ;;  %vm600_vm13 = vcmask 851712   ;;  %vm607_vm14 = vcmask 917312   ;;  %vm614_vm15 = vcmask 982912  }
   0x5   :  { %684 = vmatprep.mubr.msk.bf16.mxu0 %vm92_vm0, %v45_v5  ;;  %v47_v12 = vpack.c.bf16 %v34_v10, %v33_v9  ;;  %v37_v15 = vld [vmem:[%s979_s0 + $0x40] sm:$0xff]  ;;  %v38_v16 = vld [vmem:[%s979_s0 + $0x48] sm:$0xff]  ;;  %v48_v17 = vpack.c.bf16 %v36_v14, %v35_v13  ;;  %v39_v19 = vld [vmem:[%s979_s0 + $0x50] sm:$0xff] }
   0x6   :  { %v49_v18 = vpack.c.bf16 %v38_v16, %v37_v15  ;;  %v40_v20 = vld [vmem:[%s979_s0 + $0x58] sm:$0xff]  ;;  %v41_v21 = vld [vmem:[%s979_s0 + $0x60] sm:$0xff]  ;;  %v42_v22 = vld [vmem:[%s979_s0 + $0x68] sm:$0xff] }
   0x7   :  { %679 = vmatpush3.bf16.msra.mxu0 %v724_v1  ;;  %v50_v23 = vpack.c.bf16 %v40_v20, %v39_v19  ;;  %v51_v24 = vpack.c.bf16 %v42_v22, %v41_v21  ;;  %v43_v25 = vld [vmem:[%s979_s0 + $0x70] sm:$0xff]  ;;  %v44_v26 = vld [vmem:[%s979_s0 + $0x78] sm:$0xff]  ;;  %v727_v28 = vld [vmem:[%s980_s3 + $0x8] sm:$0xff]  }
   0x8   :  { %680 = vmatprep.subr.bf16.mxu0 %v725_v2  ;;  %v52_v27 = vpack.c.bf16 %v44_v26, %v43_v25  ;;  %700 = vmatprep.subr.bf16.mxu1 %v727_v28  ;;  %v728_v29 = vld [vmem:[%s980_s3] sm:$0xff]  }
   0x9   :  { %701 = vmatpush3.bf16.msra.mxu1 %v727_v28  ;;  %v629_v32 = vld [vmem:[%s981_s2] ss:$0 sm:$0xff] }
   0xa   :  { %702 = vmatprep.subr.bf16.mxu1 %v728_v29  ;;  %v861_v25 = vld [vmem:[%s983_s4] ss:$0 sm:$0xff] }
   0xb   :  { %681 = vmatpush3.bf16.msra.mxu0 %v725_v2 }
   0xc   :  { %682 = vmatprep.subr.bf16.mxu0 %v726_v6 }
   0xd   :  { %703 = vmatpush3.bf16.msra.mxu1 %v728_v29  ;;  %v867_v29 = vld [vmem:[%s984_s5] ss:$0 sm:$0xff] }
   0xf   :  { %683 = vmatpush3.bf16.msra.mxu0 %v726_v6 }
  0x12   :  { %685 = vmatmul.mubr.msk.bf16.vlgmr.msra.gmra.mxu0 %vm92_vm0, %v46_v11 }
  0x13   :  { %688 = vmatprep.mubr.msk.bf16.mxu0 %vm92_vm0, %v47_v12 }
  0x1a   :  { %689 = vmatmul.mubr.msk.bf16.gmra.mxu0 %vm92_vm0, %v48_v17 }
  0x1b   :  { %692 = vmatprep.mubr.msk.bf16.mxu0 %vm92_vm0, %v49_v18 }
  0x22   :  { %693 = vmatmul.mubr.msk.bf16.gmra.mxu0 %vm92_vm0, %v50_v23  ;;  %v12_v23 = vstv %s982_s6 }
  0x23   :  { %696 = vmatprep.mubr.msk.bf16.mxu0 %vm92_vm0, %v51_v24  ;;  %13 = vst [vmem:[#allocation2] sm:$0x1] %v12_v23  ;;  %v729_v24 = vmov 0  }
  0x24   :  { %721 = vset.pattern.permute.xlu1 %v729_v24  ;;  %722 = vset.pattern.permute.xlu0 %v729_v24 }
  0x2a   :  { %697 = vmatmul.mubr.msk.bf16.gmra.mxu0 %vm92_vm0, %v52_v27  ;;  %vm621_vm0 = vcmask 1048512  }
  0xd2   :  { %v686_v30 = vpop.f32.mrf.mxu0 }
  0xd3   :  { %v160_v36 = vadd.f32 %v686_v30, %v629_v32 }
  0xd4   :  { %v151_v31 = vpop.f32.mrf.mxu0 }
  0xd5   :  { %v152_v34 = vadd.f32 %v629_v32, %v151_v31  ;;  %v216_v43 = vmax.f32 %v160_v36, 0.0 }
  0xd6   :  { %v687_v33 = vpop.f32.mrf.mxu0 }
  0xd7   :  { %v163_v35 = vadd.f32 %v687_v33, %v629_v32  ;;  %v214_v41 = vmax.f32 %v152_v34, 0.0 }
  0xd8   :  { %v154_v37 = vpop.f32.mrf.mxu0 }
  0xd9   :  { %v155_v38 = vadd.f32 %v629_v32, %v154_v37  ;;  %v217_v39 = vmax.f32 %v163_v35, 0.0 }
  0xda   :  { %v690_v40 = vpop.f32.mrf.mxu0 }
  0xdb   :  { %v215_v42 = vmax.f32 %v155_v38, 0.0  ;;  %v231_v46 = vpack.c.bf16 %v217_v39, %v216_v43  ;;  %v176_v50 = vadd.f32 %v690_v40, %v629_v32 }
  0xdc   :  { %v167_v44 = vpop.f32.mrf.mxu0 }
  0xdd   :  { %v230_v45 = vpack.c.bf16 %v215_v42, %v214_v41  ;;  %v168_v48 = vadd.f32 %v629_v32, %v167_v44  ;;  %v220_v57 = vmax.f32 %v176_v50, 0.0 }
  0xde   :  { %v691_v47 = vpop.f32.mrf.mxu0 }
  0xdf   :  { %v179_v49 = vadd.f32 %v691_v47, %v629_v32  ;;  %704 = vmatprep.mubr.msk.bf16.mxu1 %vm261_vm1, %v230_v45  ;;  %v218_v55 = vmax.f32 %v168_v48, 0.0 }
  0xe0   :  { %v170_v51 = vpop.f32.mrf.mxu0  ;;  %705 = vmatmul.mubr.msk.bf16.vlgmr.msra.gmra.mxu1 %vm261_vm1, %v231_v46 }
  0xe1   :  { %v171_v52 = vadd.f32 %v629_v32, %v170_v51  ;;  %v221_v53 = vmax.f32 %v179_v49, 0.0 }
  0xe2   :  { %v694_v54 = vpop.f32.mrf.mxu0 }
  0xe3   :  { %v219_v56 = vmax.f32 %v171_v52, 0.0  ;;  %v192_v58 = vadd.f32 %v694_v54, %v629_v32  ;;  %v233_v62 = vpack.c.bf16 %v221_v53, %v220_v57 }
  0xe4   :  { %v183_v59 = vpop.f32.mrf.mxu0 }
  0xe5   :  { %v232_v60 = vpack.c.bf16 %v219_v56, %v218_v55  ;;  %v184_v61 = vadd.f32 %v629_v32, %v183_v59  ;;  %v224_v1 = vmax.f32 %v192_v58, 0.0 }
  0xe6   :  { %v695_v63 = vpop.f32.mrf.mxu0 }
  0xe7   :  { %708 = vmatprep.mubr.msk.bf16.mxu1 %vm261_vm1, %v232_v60  ;;  %v195_v0 = vadd.f32 %v695_v63, %v629_v32  ;;  %v222_v3 = vmax.f32 %v184_v61, 0.0 }
  0xe8   :  { %709 = vmatmul.mubr.msk.bf16.gmra.mxu1 %vm261_vm1, %v233_v62  ;;  %v186_v2 = vpop.f32.mrf.mxu0 }
  0xe9   :  { %v225_v4 = vmax.f32 %v195_v0, 0.0  ;;  %v187_v5 = vadd.f32 %v629_v32, %v186_v2 }
  0xea   :  { %v698_v6 = vpop.f32.mrf.mxu0 }
  0xeb   :  { %v223_v7 = vmax.f32 %v187_v5, 0.0  ;;  %v235_v8 = vpack.c.bf16 %v225_v4, %v224_v1  ;;  %v208_v9 = vadd.f32 %v698_v6, %v629_v32 }
  0xec   :  { %v199_v10 = vpop.f32.mrf.mxu0 }
  0xed   :  { %v234_v11 = vpack.c.bf16 %v223_v7, %v222_v3  ;;  %v200_v12 = vadd.f32 %v629_v32, %v199_v10  ;;  %v228_v15 = vmax.f32 %v208_v9, 0.0 }
  0xee   :  { %v699_v13 = vpop.f32.mrf.mxu0 }
  0xef   :  { %712 = vmatprep.mubr.msk.bf16.mxu1 %vm261_vm1, %v234_v11  ;;  %v211_v14 = vadd.f32 %v699_v13, %v629_v32  ;;  %v226_v17 = vmax.f32 %v200_v12, 0.0 }
  0xf0   :  { %713 = vmatmul.mubr.msk.bf16.gmra.mxu1 %vm261_vm1, %v235_v8  ;;  %v202_v16 = vpop.f32.mrf.mxu0 }
  0xf1   :  { %v229_v18 = vmax.f32 %v211_v14, 0.0  ;;  %v203_v19 = vadd.f32 %v629_v32, %v202_v16 }
  0xf3   :  { %v227_v20 = vmax.f32 %v203_v19, 0.0  ;;  %v237_v21 = vpack.c.bf16 %v229_v18, %v228_v15 }
  0xf5   :  { %v236_v22 = vpack.c.bf16 %v227_v20, %v226_v17 }
  0xf7   :  { %716 = vmatprep.mubr.msk.bf16.mxu1 %vm261_vm1, %v236_v22 }
  0xf8   :  { %717 = vmatmul.mubr.msk.bf16.gmra.mxu1 %vm261_vm1, %v237_v21 }
 0x1a0   :  { %v706_v26 = vpop.f32.mrf.mxu1 }
 0x1a1   :  { %v329_v27 = vadd.f32 %v706_v26, %v861_v25 }
 0x1a2   :  { %v320_v28 = vpop.f32.mrf.mxu1 }
 0x1a3   :  { %v385_v30 = vmax.f32 %v329_v27, 0.0  ;;  %v321_v31 = vadd.f32 %v861_v25, %v320_v28 }
 0x1a4   :  { %v707_v32 = vpop.f32.mrf.mxu1 }
 0x1a5   :  { %v383_v33 = vmax.f32 %v321_v31, 0.0  ;;  %v332_v34 = vadd.f32 %v707_v32, %v861_v25  ;;  %v408_v35 = vmul.f32 %v867_v29, %v385_v30 }
 0x1a6   :  { %v323_v36 = vpop.f32.mrf.mxu1 }
 0x1a7   :  { %v386_v37 = vmax.f32 %v332_v34, 0.0  ;;  %v324_v38 = vadd.f32 %v861_v25, %v323_v36  ;;  %v428_v39 = vsel %vm261_vm1, %v408_v35, 0.0  ;;  %v406_v40 = vmul.f32 %v867_v29, %v383_v33  ;;  %v470_v34 = vld [vmem:[#allocation2] sm:$0x1] }
 0x1a8   :  { %429 = vadd.xlane.f32.xlu1 %v428_v39  ;;  %v710_v41 = vpop.f32.mrf.mxu1 }
 0x1a9   :  { %v384_v42 = vmax.f32 %v324_v38, 0.0  ;;  %v345_v43 = vadd.f32 %v710_v41, %v861_v25  ;;  %v422_v44 = vsel %vm261_vm1, %v406_v40, 0.0  ;;  %v409_v45 = vmul.f32 %v867_v29, %v386_v37 }
 0x1aa   :  { %v336_v46 = vpop.f32.mrf.mxu1  ;;  %423 = vadd.xlane.f32.xlu0 %v422_v44 }
 0x1ab   :  { %v389_v47 = vmax.f32 %v345_v43, 0.0  ;;  %v337_v48 = vadd.f32 %v861_v25, %v336_v46  ;;  %v431_v49 = vsel %vm261_vm1, %v409_v45, 0.0  ;;  %v407_v50 = vmul.f32 %v867_v29, %v384_v42 }
 0x1ac   :  { %432 = vadd.xlane.f32.xlu1 %v431_v49  ;;  %v711_v51 = vpop.f32.mrf.mxu1 }
 0x1ad   :  { %v387_v52 = vmax.f32 %v337_v48, 0.0  ;;  %v348_v53 = vadd.f32 %v711_v51, %v861_v25  ;;  %v425_v54 = vsel %vm261_vm1, %v407_v50, 0.0  ;;  %v412_v55 = vmul.f32 %v867_v29, %v389_v47 }
 0x1ae   :  { %v339_v56 = vpop.f32.mrf.mxu1  ;;  %426 = vadd.xlane.f32.xlu0 %v425_v54  ;;  %v476_v51 = vlaneseq }
 0x1af   :  { %v340_v57 = vadd.f32 %v861_v25, %v339_v56  ;;  %v390_v58 = vmax.f32 %v348_v53, 0.0  ;;  %v440_v61 = vsel %vm261_vm1, %v412_v55, 0.0  ;;  %v410_v63 = vmul.f32 %v867_v29, %v387_v52 }
 0x1b0   :  { %v714_v59 = vpop.f32.mrf.mxu1  ;;  %v916_v54 = vshrl.u32 %v476_v51, 7  ;;  %v919_v55 = vand.u32 127, %v476_v51 }
 0x1b1   :  { %v388_v60 = vmax.f32 %v340_v57, 0.0  ;;  %v361_v62 = vadd.f32 %v714_v59, %v861_v25  ;;  %v434_v6 = vsel %vm261_vm1, %v410_v63, 0.0  ;;  %v413_v7 = vmul.f32 %v867_v29, %v390_v58 }
 0x1b2   :  { %441 = vadd.xlane.f32.xlu0 %v440_v61  ;;  %v352_v0 = vpop.f32.mrf.mxu1  ;;  %v518_v59 = vadd.s32 4294967288, %v919_v55 }
 0x1b3   :  { %v393_v1 = vmax.f32 %v361_v62, 0.0  ;;  %v411_v2 = vmul.f32 %v867_v29, %v388_v60  ;;  %v353_v3 = vadd.f32 %v861_v25, %v352_v0  ;;  %v443_v15 = vsel %vm261_vm1, %v413_v7, 0.0 }
 0x1b4   :  { %v715_v4 = vpop.f32.mrf.mxu1  ;;  %v525_v60 = vadd.s32 4294967280, %v919_v55  ;;  %v516_v0 = vsub.s32 %v919_v55, %v916_v54 }
 0x1b5   :  { %v437_v5 = vsel %vm261_vm1, %v411_v2, 0.0  ;;  %v364_v8 = vadd.f32 %v715_v4, %v861_v25  ;;  %v391_v10 = vmax.f32 %v353_v3, 0.0  ;;  %v416_v13 = vmul.f32 %v867_v29, %v393_v1 }
 0x1b6   :  { %438 = vadd.xlane.f32.xlu1 %v437_v5  ;;  %435 = vadd.xlane.f32.xlu0 %v434_v6  ;;  %v355_v9 = vpop.f32.mrf.mxu1  ;;  %v521_v1 = vsub.s32 %v518_v59, %v916_v54  ;;  %v528_v3 = vsub.s32 %v525_v60, %v916_v54  ;;  %v532_v6 = vadd.s32 4294967272, %v919_v55 }
 0x1b7   :  { %v394_v11 = vmax.f32 %v364_v8, 0.0  ;;  %v356_v12 = vadd.f32 %v861_v25, %v355_v9  ;;  %v452_v19 = vsel %vm261_vm1, %v416_v13, 0.0  ;;  %v414_v21 = vmul.f32 %v867_v29, %v391_v10 }
 0x1b8   :  { %v718_v14 = vpop.f32.mrf.mxu1  ;;  %v539_v9 = vadd.s32 4294967264, %v919_v55  ;;  %v546_v13 = vadd.s32 4294967256, %v919_v55 }
 0x1b9   :  { %v417_v16 = vmul.f32 %v867_v29, %v394_v11  ;;  %v392_v18 = vmax.f32 %v356_v12, 0.0  ;;  %v377_v20 = vadd.f32 %v718_v14, %v861_v25  ;;  %v446_v24 = vsel %vm261_vm1, %v414_v21, 0.0 }
 0x1ba   :  { %444 = vadd.xlane.f32.xlu0 %v443_v15  ;;  %v368_v17 = vpop.f32.mrf.mxu1  ;;  %v535_v12 = vsub.s32 %v532_v6, %v916_v54 }
 0x1bb   :  { %v397_v23 = vmax.f32 %v377_v20, 0.0  ;;  %v369_v26 = vadd.f32 %v861_v25, %v368_v17  ;;  %v415_v27 = vmul.f32 %v867_v29, %v392_v18 }
 0x1bc   :  { %v719_v22 = vpop.f32.mrf.mxu1 }
 0x1bd   :  { %v395_v30 = vmax.f32 %v369_v26, 0.0  ;;  %v449_v31 = vsel %vm261_vm1, %v415_v27, 0.0  ;;  %v420_v33 = vmul.f32 %v867_v29, %v397_v23  ;;  %v380_v35 = vadd.f32 %v719_v22, %v861_v25 }
 0x1be   :  { %453 = vadd.xlane.f32.xlu0 %v452_v19  ;;  %v371_v28 = vpop.f32.mrf.mxu1  ;;  %v553_v19 = vadd.s32 4294967248, %v919_v55  ;;  %v549_v22 = vsub.s32 %v546_v13, %v916_v54  ;;  %v560_v26 = vadd.s32 4294967240, %v919_v55 }
 0x1bf   :  { %v372_v32 = vadd.f32 %v861_v25, %v371_v28  ;;  %v464_v37 = vsel %vm261_vm1, %v420_v33, 0.0  ;;  %v418_v38 = vmul.f32 %v867_v29, %v395_v30  ;;  %v398_v39 = vmax.f32 %v380_v35, 0.0 }
 0x1c0   :  { %v455_v25 = vsel %vm261_vm1, %v417_v16, 0.0  ;;  %v542_v16 = vsub.s32 %v539_v9, %v916_v54  ;;  %v567_v30 = vadd.s32 4294967232, %v919_v55  ;;  %v574_v33 = vadd.s32 4294967224, %v919_v55 }
 0x1c1   :  { %v396_v36 = vmax.f32 %v372_v32, 0.0  ;;  %v458_v40 = vsel %vm261_vm1, %v418_v38, 0.0  ;;  %v421_v43 = vmul.f32 %v867_v29, %v398_v39  ;;  %v563_v35 = vsub.s32 %v560_v26, %v916_v54 }
 0x1c2   :  { %447 = vadd.xlane.f32.xlu0 %v446_v24  ;;  %v556_v24 = vsub.s32 %v553_v19, %v916_v54  ;;  %v570_v38 = vsub.s32 %v567_v30, %v916_v54 }
 0x1c3   :  { %v419_v41 = vmul.f32 %v867_v29, %v396_v36  ;;  %v467_v44 = vsel %vm261_vm1, %v421_v43, 0.0  ;;  %v478_v29 = vsub.s32 0, %v916_v54  ;;  %v581_v43 = vadd.s32 4294967216, %v919_v55 }
 0x1c5   :  { %v461_v42 = vsel %vm261_vm1, %v419_v41, 0.0  ;;  %v584_v51 = vsub.s32 %v581_v43, %v916_v54 }
 0x1c6   :  { %450 = vadd.xlane.f32.xlu0 %v449_v31 }
 0x1c7   :  { %473 = vperm.xlu1 %721, %v470_v34  }
 0x1ca   :  { %465 = vadd.xlane.f32.xlu0 %v464_v37 }
 0x1ce   :  { %459 = vadd.xlane.f32.xlu0 %v458_v40  ;;  %v577_v40 = vsub.s32 %v574_v33, %v916_v54 }
 0x1d2   :  { %462 = vadd.xlane.f32.xlu0 %v461_v42 }
 0x1d6   :  { %468 = vadd.xlane.f32.xlu0 %v467_v44 }
 0x1eb   :  { %456 = vadd.xlane.f32.xlu1 %v455_v25 }
 0x231   :  { %v430_v48 = vpop.xlane.xlu1 %429 }
 0x233   :  { %v424_v45 = vpop.xlane.xlu0 %423 }
 0x235   :  { %v433_v50 = vpop.xlane.xlu1 %432 }
 0x237   :  { %v427_v46 = vpop.xlane.xlu0 %426 }
 0x23b   :  { %v442_v47 = vpop.xlane.xlu0 %441 }
 0x23f   :  { %v436_v49 = vpop.xlane.xlu0 %435  ;;  %v439_v52 = vpop.xlane.xlu1 %438 }
 0x243   :  { %v445_v53 = vpop.xlane.xlu0 %444  ;;  %v474_v56 = vpop.permute.xlu1 %473 }
 0x244   :  { %v923_v58 = vrot.slane %v474_v56, %v478_v29  ;;  %v616_v29 = vadd.s32 4294967176, %v919_v55 }
 0x246   :  { %v480_v62 = vadd.f32 %v923_v58, %v424_v45  ;;  %v481_v63 = vadd.f32 %v923_v58, %v427_v46  ;;  %v482_v2 = vadd.f32 %v923_v58, %v430_v48  ;;  %v483_v10 = vadd.f32 %v923_v58, %v433_v50 }
 0x247   :  { %v921_v57 = vpop.xlane.xlu0 %453  ;;  %v484_v14 = vadd.f32 %v923_v58, %v436_v49  ;;  %v485_v20 = vadd.f32 %v923_v58, %v439_v52  ;;  %v486_v27 = vadd.f32 %v923_v58, %v442_v47  ;;  %v487_v36 = vadd.f32 %v923_v58, %v445_v53 }
 0x248   :  { %v517_v4 = vrot.slane %v480_v62, %v516_v0  ;;  %v522_v5 = vrot.slane %v481_v63, %v521_v1  ;;  %v529_v8 = vrot.slane %v482_v2, %v528_v3  ;;  %v536_v18 = vrot.slane %v483_v10, %v535_v12 }
 0x249   :  { %v543_v23 = vrot.slane %v484_v14, %v542_v16  ;;  %v550_v32 = vrot.slane %v485_v20, %v549_v22  ;;  %v557_v37 = vrot.slane %v486_v27, %v556_v24  ;;  %v564_v25 = vrot.slane %v487_v36, %v563_v35 }
 0x24a   :  { %v524_v11 = vsel %vm523_vm2, %v522_v5, %v517_v4  ;;  %v588_v45 = vadd.s32 4294967208, %v919_v55  ;;  %v595_v47 = vadd.s32 4294967200, %v919_v55  ;;  %v602_v50 = vadd.s32 4294967192, %v919_v55 }
 0x24b   :  { %v448_v61 = vpop.xlane.xlu0 %447  ;;  %v531_v15 = vsel %vm530_vm3, %v529_v8, %v524_v11  ;;  %v490_v52 = vadd.f32 %v923_v58, %v921_v57  ;;  %v609_v53 = vadd.s32 4294967184, %v919_v55  ;;  %v619_v5 = vsub.s32 %v616_v29, %v916_v54 }
 0x24c   :  { %v538_v21 = vsel %vm537_vm4, %v536_v18, %v531_v15  ;;  %v488_v39 = vadd.f32 %v923_v58, %v448_v61  ;;  %v591_v56 = vsub.s32 %v588_v45, %v916_v54  ;;  %v598_v60 = vsub.s32 %v595_v47, %v916_v54 }
 0x24d   :  { %v545_v28 = vsel %vm544_vm5, %v543_v23, %v538_v21  ;;  %v605_v1 = vsub.s32 %v602_v50, %v916_v54  ;;  %v585_v3 = vrot.slane %v490_v52, %v584_v51  ;;  %v612_v55 = vsub.s32 %v609_v53, %v916_v54 }
 0x24e   :  { %v552_v34 = vsel %vm551_vm6, %v550_v32, %v545_v28  ;;  %v571_v46 = vrot.slane %v488_v39, %v570_v38 }
 0x24f   :  { %v451_v7 = vpop.xlane.xlu0 %450  ;;  %v559_v42 = vsel %vm558_vm7, %v557_v37, %v552_v34 }
 0x250   :  { %v489_v41 = vadd.f32 %v923_v58, %v451_v7  ;;  %v566_v48 = vsel %vm565_vm8, %v564_v25, %v559_v42 }
 0x251   :  { %v573_v59 = vsel %vm572_vm9, %v571_v46, %v566_v48 }
 0x252   :  { %v578_v49 = vrot.slane %v489_v41, %v577_v40 }
 0x253   :  { %v466_v17 = vpop.xlane.xlu0 %465 }
 0x254   :  { %v580_v0 = vsel %vm579_vm10, %v578_v49, %v573_v59  ;;  %v494_v4 = vadd.f32 %v923_v58, %v466_v17 }
 0x255   :  { %v587_v9 = vsel %vm586_vm11, %v585_v3, %v580_v0 }
 0x256   :  { %v613_v12 = vrot.slane %v494_v4, %v612_v55 }
 0x257   :  { %v460_v31 = vpop.xlane.xlu0 %459 }
 0x258   :  { %v492_v61 = vadd.f32 %v923_v58, %v460_v31 }
 0x25a   :  { %v599_v8 = vrot.slane %v492_v61, %v598_v60 }
 0x25b   :  { %v463_v44 = vpop.xlane.xlu0 %462 }
 0x25c   :  { %v493_v57 = vadd.f32 %v923_v58, %v463_v44 }
 0x25e   :  { %v606_v10 = vrot.slane %v493_v57, %v605_v1 }
 0x25f   :  { %v469_v62 = vpop.xlane.xlu0 %468 }
 0x260   :  { %v495_v6 = vadd.f32 %v923_v58, %v469_v62 }
 0x262   :  { %v620_v14 = vrot.slane %v495_v6, %v619_v5 }
 0x274   :  { %v457_v63 = vpop.xlane.xlu1 %456 }
 0x275   :  { %v491_v2 = vadd.f32 %v923_v58, %v457_v63 }
 0x277   :  { %v592_v7 = vrot.slane %v491_v2, %v591_v56 }
 0x279   :  { %v594_v11 = vsel %vm593_vm12, %v592_v7, %v587_v9 }
 0x27a   :  { %v601_v13 = vsel %vm600_vm13, %v599_v8, %v594_v11 }
 0x27b   :  { %v608_v15 = vsel %vm607_vm14, %v606_v10, %v601_v13 }
 0x27c   :  { %v615_v16 = vsel %vm614_vm15, %v613_v12, %v608_v15 }
 0x27d   :  { %v622_v17 = vsel %vm621_vm0, %v620_v14, %v615_v16 }
 0x27e   :  { %624 = vst [vmem:[%s985_s7] sm:$0x1] %v622_v17 }

</bundles_post_ra>
